<compile_context>
chip_gen: v7x
topology: tpu7x:2x2x1
jax: 0.10.0
libtpu: 0.0.40
codegen_flags: <defaults>
</compile_context>

<pallas_src>
import itertools
import math
from concurrent.futures import ThreadPoolExecutor

import numpy as np
import jax
import jax.numpy as jnp
from jax.experimental import pallas as pl
from jax.experimental.pallas import tpu as pltpu


def _round_up(x, m):
    return ((x + m - 1) // m) * m


def _device_info():
    """(tensorcores per chip, physical VMEM bytes) - heuristic, safe default."""
    try:
        kind = jax.devices()[0].device_kind.lower()
    except Exception:
        kind = ""
    if "v7" in kind or "7x" in kind:
        return 2, 64 * 1024 * 1024          # v7x: 2 TCs, 64 MiB VMEM per TC
    return 1, 128 * 1024 * 1024              # v5e / v6e: 1 TC, 128 MiB VMEM


def _vmem_bytes(tm, tt, c, d):
    # double-buffered f32 input/output tiles for one grid step
    return 4 * (2 * tm * c + 2 * tm * d + 2 * c * tt + 2 * d * tt + 2 * tm * tt)


def _make_cost_kernel(n_box_dims, bbox_negative):
    def kernel(logits_ref, boxes_ref, onehot_ref, tb_ref, out_ref):
        # Softmax numerator only; normalization is fused into the gathered
        # columns so the full (TM, C) probability matrix is never divided.
        logits = logits_ref[...]                               # (TM, C) f32
        m = jnp.max(logits, axis=-1, keepdims=True)
        e = jnp.exp(logits - m)                                # (TM, C)
        denom = jnp.sum(e, axis=-1, keepdims=True)             # (TM, 1)

        # cost_class: column gather as a one-hot matmul on the MXU.  The
        # one-hot already carries -cost_class (folded in the wrapper), so the
        # class term is just g * rcp(denom).  Exact EUP reciprocal + HIGHEST
        # matmul precision -> no near-tie assignment flips (C is tiny, the
        # MXU has plenty of slack vs the VALU-bound elementwise work).
        g = jnp.dot(e, onehot_ref[...],
                    preferred_element_type=jnp.float32,
                    precision=jax.lax.Precision.HIGHEST)       # (TM, TT)
        acc = g * pl.reciprocal(denom, approx=False)

        # cost_bbox: L1 cdist as a D-step accumulation over lane-dense tiles.
        # boxes / tb are pre-scaled by |cost_bbox| in the wrapper, so there is
        # no per-tile weight multiply and no zero-init (acc starts at the
        # class term).  The per-d column/row broadcasts ride the broadcast /
        # XLU path, off the saturating VALU slot.
        boxes = boxes_ref[...]                                 # (TM, D)
        tb = tb_ref[...]                                       # (D, TT)
        for d in range(n_box_dims):
            diff = jnp.abs(boxes[:, d:d + 1] - tb[d:d + 1, :])
            acc = (acc - diff) if bbox_negative else (acc + diff)

        out_ref[...] = acc                                     # one lane-dense store

    return kernel


def pallas_cost_matrix(logits2d, boxes2d, target_ids, target_boxes,
                       cost_bbox_w, cost_class_w,
                       block_rows=1024, max_col_tile=2048):
    """Returns the padded (N_pad, T_pad) matching cost matrix (slice on host)."""
    logits2d = logits2d.astype(jnp.float32)
    boxes2d = boxes2d.astype(jnp.float32)
    N, C = logits2d.shape
    D = boxes2d.shape[1]
    T = int(target_boxes.shape[0])

    # Lane-dense target axis: pad T to a multiple of 128 (and of the column
    # tile when T is large enough to need column tiling on v7x's VMEM).
    T_pad = _round_up(max(T, 1), 128)
    if T_pad > max_col_tile:
        TT = max_col_tile
        T_pad = _round_up(T_pad, TT)
    else:
        TT = T_pad

    # Fold -cost_class into the (tiny) one-hot gather matrix.
    onehot = (-float(cost_class_w)) * jax.nn.one_hot(
        target_ids, C, dtype=jnp.float32).T                    # (C, T)
    onehot = jnp.pad(onehot, ((0, 0), (0, T_pad - T)))          # (C, T_pad)

    # Fold |cost_bbox| into the (tiny) box operands: |w*b - w*t| = |w|*|b-t|.
    bbox_scale = abs(float(cost_bbox_w))
    bbox_negative = float(cost_bbox_w) < 0.0
    boxes2d = boxes2d * bbox_scale
    tb_T = jnp.pad(target_boxes.astype(jnp.float32).T * bbox_scale,
                   ((0, 0), (0, T_pad - T)))                    # (D, T_pad)

    # Row tiling: large tiles on single-TC chips (v5e/v6e), >=4 grid steps on
    # v7x so both TensorCores get work; shrink until tiles fit the VMEM budget.
    num_cores, vmem_phys = _device_info()
    TM = min(block_rows, _round_up(N, 8))
    if num_cores > 1:
        target_steps = 4
        TM = min(TM, max(8, _round_up(math.ceil(N / target_steps), 8)))
    vmem_budget = int(0.45 * vmem_phys)
    while _vmem_bytes(TM, TT, C, D) > vmem_budget and TM > 8:
        TM = max(8, _round_up(TM // 2, 8))

    N_pad = _round_up(N, TM)
    if N_pad != N:
        logits2d = jnp.pad(logits2d, ((0, N_pad - N), (0, 0)))
        boxes2d = jnp.pad(boxes2d, ((0, N_pad - N), (0, 0)))

    grid = (N_pad // TM, T_pad // TT)
    cost_est = pl.CostEstimate(
        flops=2 * N_pad * C * T_pad + (3 * D + 2) * N_pad * T_pad,
        transcendentals=N_pad * C * (T_pad // TT),
        bytes_accessed=4 * (N_pad * C + N_pad * D + C * T_pad + D * T_pad
                            + N_pad * T_pad),
    )
    vmem_limit = max(32 << 20, _vmem_bytes(TM, TT, C, D) + (8 << 20))
    vmem_limit = min(vmem_limit, int(0.9 * vmem_phys))

    out = pl.pallas_call(
        _make_cost_kernel(D, bbox_negative),
        out_shape=jax.ShapeDtypeStruct((N_pad, T_pad), jnp.float32),
        grid=grid,
        in_specs=[
            pl.BlockSpec((TM, C), lambda i, j: (i, 0)),      # logits tile
            pl.BlockSpec((TM, D), lambda i, j: (i, 0)),      # |w_box|*boxes tile
            pl.BlockSpec((C, TT), lambda i, j: (0, j)),      # -w_cls * one-hot
            pl.BlockSpec((D, TT), lambda i, j: (0, j)),      # |w_box|*targets^T
        ],
        out_specs=pl.BlockSpec((TM, TT), lambda i, j: (i, j)),
        compiler_params=pltpu.CompilerParams(
            dimension_semantics=("parallel", "parallel"),
            vmem_limit_bytes=vmem_limit,
        ),
        cost_estimate=cost_est,
    )(logits2d, boxes2d, onehot, tb_T)

    return out   # padded; row/column slicing is done on host (NumPy)


def _brute_force_lsa(c):
    """Exact assignment for a small (n_queries, size) cost block."""
    nq, sz = c.shape
    n_perms = math.perm(nq, sz)
    if n_perms > 1_000_000:
        raise RuntimeError(
            "scipy unavailable and brute-force assignment would enumerate "
            f"{n_perms} permutations; install scipy for this problem size.")
    best_rows, best_cost = None, np.inf
    for rows in itertools.permutations(range(nq), sz):
        tot = sum(c[rows[j], j] for j in range(sz))
        if tot < best_cost:
            best_cost, best_rows = tot, rows
    pairs = sorted(zip(best_rows, range(sz)))
    return [p[0] for p in pairs], [p[1] for p in pairs]


def _linear_sum_assignment(c):
    # TODO(synk): the Hungarian solver is a sequential combinatorial algorithm
    # with no clean Pallas equivalent; it stays on host (scipy if available,
    # else an exact brute force valid only for small n_queries/sizes).
    try:
        from scipy.optimize import linear_sum_assignment as _lsa
    except ImportError:
        return _brute_force_lsa(np.asarray(c))
    rows, cols = _lsa(c)
    return list(rows), list(cols)


class HungarianMatcherPallas:
    def __init__(self, cost_class, cost_bbox, cost_giou):
        assert cost_class != 0 or cost_bbox != 0 or cost_giou != 0, \
            "all costs cant be 0"
        self.cost_class = cost_class
        self.cost_bbox = cost_bbox
        # NOTE: the reference forward() also never uses cost_giou (it only
        # combines the bbox-L1 and class terms), so it is stored but unused.
        self.cost_giou = cost_giou

    def __call__(self, outputs, targets, sizes):
        logits = outputs['class']                      # (bs, nq, C)
        boxes = outputs['box']                         # (bs, nq, D)
        bs, nq, C = logits.shape
        D = boxes.shape[-1]
        N = bs * nq

        logits2d = logits.reshape(N, C)
        boxes2d = boxes.reshape(N, D)

        # targets: (T_total, D+1) with the class id in column 4
        target_ids = jnp.asarray(targets[:, 4], jnp.int32)
        target_boxes = jnp.concatenate(
            [targets[:, 0:4], targets[:, 5:]], axis=1).astype(jnp.float32)
        T = int(target_boxes.shape[0])

        cost_dev = pallas_cost_matrix(
            logits2d, boxes2d, target_ids, target_boxes,
            self.cost_bbox, self.cost_class)

        # Async D2H of the padded matrix; all row/column slicing happens in
        # NumPy (no extra non-lane-aligned device-side [:T] copy).
        try:
            cost_dev.copy_to_host_async()
        except AttributeError:
            pass
        cost_full = np.asarray(jax.block_until_ready(cost_dev))
        cost_np = cost_full[:N, :T]
        cost_bnt = cost_np.reshape(bs, nq, T)

        # Per-image assignment on host; scipy LSA calls overlap on a thread pool.
        offsets = np.cumsum([0] + list(sizes))
        jobs = []
        with ThreadPoolExecutor(max_workers=max(1, min(8, bs))) as pool:
            for b in range(bs):
                sz = int(sizes[b])
                if sz == 0:
                    continue
                block = cost_bnt[b, :, offsets[b]:offsets[b + 1]]   # (nq, sz)
                jobs.append(pool.submit(_linear_sum_assignment, block))
            results = [j.result() for j in jobs]
        matched = [(np.asarray(r, dtype=np.int64), np.asarray(c, dtype=np.int64))
                   for r, c in results]
        return matched, cost_np


if __name__ == "__main__":
    key = jax.random.PRNGKey(0)
    k1, k2, k3, k4, k5 = jax.random.split(key, 5)

    bs, n_queries, n_classes, D = 2, 8, 4, 11
    sizes = [3, 2]                       # targets per image
    T = sum(sizes)

    outputs = {
        'class': jax.random.normal(k1, (bs, n_queries, n_classes), jnp.float32),
        'box':   jax.random.uniform(k2, (bs, n_queries, D), jnp.float32),
    }
    # targets tensor: columns [0:4]=box part1, [4]=class id, [5:]=box part2
    t_front = jax.random.uniform(k3, (T, 4), jnp.float32)
    t_cls = jax.random.randint(k4, (T, 1), 0, n_classes).astype(jnp.float32)
    t_back = jax.random.uniform(k5, (T, D - 4), jnp.float32)
    targets = jnp.concatenate([t_front, t_cls, t_back], axis=1)   # (T, D+1)

    matcher = HungarianMatcherPallas(cost_class=1.0, cost_bbox=5.0, cost_giou=2.0)
    matched, cost = matcher(outputs, targets, sizes)

    # reference check (pure JAX) of the Pallas-computed cost matrix.
    logits2d = outputs['class'].reshape(bs * n_queries, n_classes)
    boxes2d = outputs['box'].reshape(bs * n_queries, D)
    tgt_ids = jnp.asarray(targets[:, 4], jnp.int32)
    tgt_boxes = jnp.concatenate([targets[:, 0:4], targets[:, 5:]], axis=1)
    prob_ref = jax.nn.softmax(logits2d, axis=-1)
    cc_ref = -prob_ref[:, tgt_ids]
    cb_ref = jnp.sum(jnp.abs(boxes2d[:, None, :] - tgt_boxes[None, :, :]), axis=-1)
    ref = 5.0 * cb_ref + 1.0 * cc_ref
    np.testing.assert_allclose(np.asarray(cost), np.asarray(ref),
                               rtol=1e-4, atol=1e-4)

    assert len(matched) == bs
    for i, (r, c) in enumerate(matched):
        assert r.dtype == np.int64 and c.dtype == np.int64
        assert len(r) == sizes[i] == len(c)

    print("KERNEL_OK")
</pallas_src>

<mosaic_0001>
module attributes {stable_mosaic.version = 11 : i64} {
  func.func @kernel(%arg0: i32, %arg1: i32, %arg2: memref<16x4xf32, #tpu.memory_space<vmem>>, %arg3: memref<16x11xf32, #tpu.memory_space<vmem>>, %arg4: memref<4x128xf32, #tpu.memory_space<vmem>>, %arg5: memref<11x128xf32, #tpu.memory_space<vmem>>, %arg6: memref<16x128xf32, #tpu.memory_space<vmem>>) attributes {dimension_semantics = [#tpu.dimension_semantics<parallel>, #tpu.dimension_semantics<parallel>], iteration_bounds = array<i64: 1, 1>, scalar_prefetch = 0 : i64, scratch_operands = 0 : i64, tpu.core_type = #tpu.core_type<tc>, window_params = [{transform_indices = @transform_0, window_bounds = array<i64: 16, 4>}, {transform_indices = @transform_1, window_bounds = array<i64: 16, 11>}, {transform_indices = @transform_2, window_bounds = array<i64: 4, 128>}, {transform_indices = @transform_3, window_bounds = array<i64: 11, 128>}, {transform_indices = @transform_4, window_bounds = array<i64: 16, 128>}]} {
    %c0 = arith.constant 0 : index
    %c0_0 = arith.constant 0 : index
    %0 = vector.load %arg2[%c0, %c0_0] : memref<16x4xf32, #tpu.memory_space<vmem>>, vector<16x4xf32>
    %cst = arith.constant dense<0xFF800000> : vector<16xf32>
    %1 = vector.multi_reduction <maximumf>, %0, %cst [1] : vector<16x4xf32> to vector<16xf32>
    %2 = vector.shape_cast %1 : vector<16xf32> to vector<16x1xf32>
    %3 = vector.broadcast %2 : vector<16x1xf32> to vector<16x4xf32>
    %4 = arith.subf %0, %3 : vector<16x4xf32>
    %5 = math.exp %4 : vector<16x4xf32>
    %cst_1 = arith.constant dense<0.000000e+00> : vector<16xf32>
    %6 = vector.multi_reduction <add>, %5, %cst_1 [1] : vector<16x4xf32> to vector<16xf32>
    %7 = vector.shape_cast %6 : vector<16xf32> to vector<16x1xf32>
    %c0_2 = arith.constant 0 : index
    %c0_3 = arith.constant 0 : index
    %8 = vector.load %arg4[%c0_2, %c0_3] : memref<4x128xf32, #tpu.memory_space<vmem>>, vector<4x128xf32>
    %cst_4 = arith.constant dense<0.000000e+00> : vector<16x128xf32>
    %9 = tpu.matmul %5, %8, %cst_4 {dimension_numbers = #tpu.dot_dimension_numbers<[1], [0], [0], [1], [0, 0, 1, 1], [], []>, precision = #tpu.contract_precision<fp32>} : vector<16x4xf32>, vector<4x128xf32>, vector<16x128xf32> -> vector<16x128xf32>
    %10 = tpu.reciprocal %7 : vector<16x1xf32> -> vector<16x1xf32>
    %11 = vector.broadcast %10 : vector<16x1xf32> to vector<16x128xf32>
    %12 = arith.mulf %9, %11 : vector<16x128xf32>
    %c0_5 = arith.constant 0 : index
    %c0_6 = arith.constant 0 : index
    %13 = vector.load %arg3[%c0_5, %c0_6] : memref<16x11xf32, #tpu.memory_space<vmem>>, vector<16x11xf32>
    %c0_7 = arith.constant 0 : index
    %c0_8 = arith.constant 0 : index
    %14 = vector.load %arg5[%c0_7, %c0_8] : memref<11x128xf32, #tpu.memory_space<vmem>>, vector<11x128xf32>
    %15 = vector.extract_strided_slice %13 {offsets = [0, 0], sizes = [16, 1], strides = [1, 1]} : vector<16x11xf32> to vector<16x1xf32>
    %16 = vector.extract_strided_slice %14 {offsets = [0, 0], sizes = [1, 128], strides = [1, 1]} : vector<11x128xf32> to vector<1x128xf32>
    %17 = vector.broadcast %15 : vector<16x1xf32> to vector<16x128xf32>
    %18 = vector.broadcast %16 : vector<1x128xf32> to vector<16x128xf32>
    %19 = arith.subf %17, %18 : vector<16x128xf32>
    %20 = math.absf %19 : vector<16x128xf32>
    %21 = arith.addf %12, %20 : vector<16x128xf32>
    %22 = vector.extract_strided_slice %13 {offsets = [0, 1], sizes = [16, 1], strides = [1, 1]} : vector<16x11xf32> to vector<16x1xf32>
    %23 = vector.extract_strided_slice %14 {offsets = [1, 0], sizes = [1, 128], strides = [1, 1]} : vector<11x128xf32> to vector<1x128xf32>
    %24 = vector.broadcast %22 : vector<16x1xf32> to vector<16x128xf32>
    %25 = vector.broadcast %23 : vector<1x128xf32> to vector<16x128xf32>
    %26 = arith.subf %24, %25 : vector<16x128xf32>
    %27 = math.absf %26 : vector<16x128xf32>
    %28 = arith.addf %21, %27 : vector<16x128xf32>
    %29 = vector.extract_strided_slice %13 {offsets = [0, 2], sizes = [16, 1], strides = [1, 1]} : vector<16x11xf32> to vector<16x1xf32>
    %30 = vector.extract_strided_slice %14 {offsets = [2, 0], sizes = [1, 128], strides = [1, 1]} : vector<11x128xf32> to vector<1x128xf32>
    %31 = vector.broadcast %29 : vector<16x1xf32> to vector<16x128xf32>
    %32 = vector.broadcast %30 : vector<1x128xf32> to vector<16x128xf32>
    %33 = arith.subf %31, %32 : vector<16x128xf32>
    %34 = math.absf %33 : vector<16x128xf32>
    %35 = arith.addf %28, %34 : vector<16x128xf32>
    %36 = vector.extract_strided_slice %13 {offsets = [0, 3], sizes = [16, 1], strides = [1, 1]} : vector<16x11xf32> to vector<16x1xf32>
    %37 = vector.extract_strided_slice %14 {offsets = [3, 0], sizes = [1, 128], strides = [1, 1]} : vector<11x128xf32> to vector<1x128xf32>
    %38 = vector.broadcast %36 : vector<16x1xf32> to vector<16x128xf32>
    %39 = vector.broadcast %37 : vector<1x128xf32> to vector<16x128xf32>
    %40 = arith.subf %38, %39 : vector<16x128xf32>
    %41 = math.absf %40 : vector<16x128xf32>
    %42 = arith.addf %35, %41 : vector<16x128xf32>
    %43 = vector.extract_strided_slice %13 {offsets = [0, 4], sizes = [16, 1], strides = [1, 1]} : vector<16x11xf32> to vector<16x1xf32>
    %44 = vector.extract_strided_slice %14 {offsets = [4, 0], sizes = [1, 128], strides = [1, 1]} : vector<11x128xf32> to vector<1x128xf32>
    %45 = vector.broadcast %43 : vector<16x1xf32> to vector<16x128xf32>
    %46 = vector.broadcast %44 : vector<1x128xf32> to vector<16x128xf32>
    %47 = arith.subf %45, %46 : vector<16x128xf32>
    %48 = math.absf %47 : vector<16x128xf32>
    %49 = arith.addf %42, %48 : vector<16x128xf32>
    %50 = vector.extract_strided_slice %13 {offsets = [0, 5], sizes = [16, 1], strides = [1, 1]} : vector<16x11xf32> to vector<16x1xf32>
    %51 = vector.extract_strided_slice %14 {offsets = [5, 0], sizes = [1, 128], strides = [1, 1]} : vector<11x128xf32> to vector<1x128xf32>
    %52 = vector.broadcast %50 : vector<16x1xf32> to vector<16x128xf32>
    %53 = vector.broadcast %51 : vector<1x128xf32> to vector<16x128xf32>
    %54 = arith.subf %52, %53 : vector<16x128xf32>
    %55 = math.absf %54 : vector<16x128xf32>
    %56 = arith.addf %49, %55 : vector<16x128xf32>
    %57 = vector.extract_strided_slice %13 {offsets = [0, 6], sizes = [16, 1], strides = [1, 1]} : vector<16x11xf32> to vector<16x1xf32>
    %58 = vector.extract_strided_slice %14 {offsets = [6, 0], sizes = [1, 128], strides = [1, 1]} : vector<11x128xf32> to vector<1x128xf32>
    %59 = vector.broadcast %57 : vector<16x1xf32> to vector<16x128xf32>
    %60 = vector.broadcast %58 : vector<1x128xf32> to vector<16x128xf32>
    %61 = arith.subf %59, %60 : vector<16x128xf32>
    %62 = math.absf %61 : vector<16x128xf32>
    %63 = arith.addf %56, %62 : vector<16x128xf32>
    %64 = vector.extract_strided_slice %13 {offsets = [0, 7], sizes = [16, 1], strides = [1, 1]} : vector<16x11xf32> to vector<16x1xf32>
    %65 = vector.extract_strided_slice %14 {offsets = [7, 0], sizes = [1, 128], strides = [1, 1]} : vector<11x128xf32> to vector<1x128xf32>
    %66 = vector.broadcast %64 : vector<16x1xf32> to vector<16x128xf32>
    %67 = vector.broadcast %65 : vector<1x128xf32> to vector<16x128xf32>
    %68 = arith.subf %66, %67 : vector<16x128xf32>
    %69 = math.absf %68 : vector<16x128xf32>
    %70 = arith.addf %63, %69 : vector<16x128xf32>
    %71 = vector.extract_strided_slice %13 {offsets = [0, 8], sizes = [16, 1], strides = [1, 1]} : vector<16x11xf32> to vector<16x1xf32>
    %72 = vector.extract_strided_slice %14 {offsets = [8, 0], sizes = [1, 128], strides = [1, 1]} : vector<11x128xf32> to vector<1x128xf32>
    %73 = vector.broadcast %71 : vector<16x1xf32> to vector<16x128xf32>
    %74 = vector.broadcast %72 : vector<1x128xf32> to vector<16x128xf32>
    %75 = arith.subf %73, %74 : vector<16x128xf32>
    %76 = math.absf %75 : vector<16x128xf32>
    %77 = arith.addf %70, %76 : vector<16x128xf32>
    %78 = vector.extract_strided_slice %13 {offsets = [0, 9], sizes = [16, 1], strides = [1, 1]} : vector<16x11xf32> to vector<16x1xf32>
    %79 = vector.extract_strided_slice %14 {offsets = [9, 0], sizes = [1, 128], strides = [1, 1]} : vector<11x128xf32> to vector<1x128xf32>
    %80 = vector.broadcast %78 : vector<16x1xf32> to vector<16x128xf32>
    %81 = vector.broadcast %79 : vector<1x128xf32> to vector<16x128xf32>
    %82 = arith.subf %80, %81 : vector<16x128xf32>
    %83 = math.absf %82 : vector<16x128xf32>
    %84 = arith.addf %77, %83 : vector<16x128xf32>
    %85 = vector.extract_strided_slice %13 {offsets = [0, 10], sizes = [16, 1], strides = [1, 1]} : vector<16x11xf32> to vector<16x1xf32>
    %86 = vector.extract_strided_slice %14 {offsets = [10, 0], sizes = [1, 128], strides = [1, 1]} : vector<11x128xf32> to vector<1x128xf32>
    %87 = vector.broadcast %85 : vector<16x1xf32> to vector<16x128xf32>
    %88 = vector.broadcast %86 : vector<1x128xf32> to vector<16x128xf32>
    %89 = arith.subf %87, %88 : vector<16x128xf32>
    %90 = math.absf %89 : vector<16x128xf32>
    %91 = arith.addf %84, %90 : vector<16x128xf32>
    %c0_9 = arith.constant 0 : index
    %c0_10 = arith.constant 0 : index
    %92 = vector.load %arg6[%c0_9, %c0_10] : memref<16x128xf32, #tpu.memory_space<vmem>>, vector<16x128xf32>
    tpu.vector_store %arg6[%c0_9, %c0_10], %91 {strides = array<i32>} : memref<16x128xf32, #tpu.memory_space<vmem>>, vector<16x128xf32>,
    return
  }
  func.func @transform_0(%arg0: i32, %arg1: i32) -> (i32, i32) {
    %c0_i32 = arith.constant 0 : i32
    %c0_i32_0 = arith.constant 0 : i32
    return %arg0, %c0_i32 : i32, i32
  }
  func.func @transform_1(%arg0: i32, %arg1: i32) -> (i32, i32) {
    %c0_i32 = arith.constant 0 : i32
    %c0_i32_0 = arith.constant 0 : i32
    return %arg0, %c0_i32 : i32, i32
  }
  func.func @transform_2(%arg0: i32, %arg1: i32) -> (i32, i32) {
    %c0_i32 = arith.constant 0 : i32
    %c0_i32_0 = arith.constant 0 : i32
    return %c0_i32, %arg1 : i32, i32
  }
  func.func @transform_3(%arg0: i32, %arg1: i32) -> (i32, i32) {
    %c0_i32 = arith.constant 0 : i32
    %c0_i32_0 = arith.constant 0 : i32
    return %c0_i32, %arg1 : i32, i32
  }
  func.func @transform_4(%arg0: i32, %arg1: i32) -> (i32, i32) {
    %c0_i32 = arith.constant 0 : i32
    return %arg0, %arg1 : i32, i32
  }
}

</mosaic_0001>

<bundles_post_ra>
// kernel: tpu_custom_call.1
= control target key start
LH: loop header
LB: loop body
LE: loop exit
PB: predicated region body
PF: predicated region fallthrough
CT: control target
= control target key end

     0   :  { %9 = vsyncpa [#allocation3], 0  ;;  %s1119_s0 = inlined_call_operand.vmem [shape: f32[16,4], index: 0, kind: input, shape index: {}]   ;;  %s1120_s1 = inlined_call_operand.vmem [shape: f32[16,11], index: 1, kind: input, shape index: {}]   ;;  %s1121_s2 = inlined_call_operand.vmem [shape: f32[4,128], index: 2, kind: input, shape index: {}]   ;;  %s1122_s3 = inlined_call_operand.hbm [shape: f32[11,128], index: 3, kind: input, shape index: {}]   ;;  %s1123_s4 = inlined_call_operand.hbm [shape: f32[16,128], index: 4, kind: output, shape index: {}]  }
   0x1   :  { %10 = vsyncpa [#allocation4], 0  ;;  %s926_s15 = smov [#allocation2]   ;;  %s878_s19 = scalar_lea.hbm %s1122_s3, 256 }
   0x2   :  { %s22_s16 = sshll.u32 %s926_s15, 4  ;;  %p879_p0 = scmp.ne.s32.totalorder %s1122_s3, %s878_s19  ;;  %s23_s16 = int_to_ptr.vmem [resolvable:$true] %s22_s16 }
   0x3   :  { %p882_p1 = scmp.lt.u32.totalorder %s878_s19, %s1122_s3 }
   0x5   :  { %p884_p2 = pnand %p882_p1, %p879_p0 }
   0x7   :  { %887 = shalt.err (!%p884_p2)
}
   0x8   :  { %s888_s24 = scalar_lea.vmem %s23_s16, 256  ;;  %p893_p4 = scmp.lt.s32.totalorder %s23_s16, %s23_s16 }
   0x9   :  { %p889_p3 = scmp.ne.s32.totalorder %s23_s16, %s888_s24  ;;  %p894_p5 = scmp.lt.s32.totalorder %s888_s24, %s888_s24 }
   0xb   :  { %p895_p6 = por %p894_p5, %p893_p4 }
   0xd   :  { %p896_p7 = pnand %p895_p6, %p889_p3 }
   0xf   :  { %899 = shalt.err (!%p896_p7)
}
  0x10   :  { %s927_s25 = smov 128   ;;  %s928_s26 = smov 8  }
  0x11   :  { %28 = dma.hbm_to_vmem [thread:$0]  %s1122_s3, 256, %s23_s16, [#allocation3], %s927_s25, %s927_s25, %s928_s26  }
  0x12   :  { %922 = dma.done.wait [#allocation3], 256  }
  0x13   :  { %923 = vsyncadd [#allocation3], 4294967040  ;;  %v929_v0 = vmov 0   ;;  %vm34_vm0 = vcmask 31744   ;;  %v984_v1 = vld [vmem:[%s1119_s0] sm:$0xff]  ;;  %v989_v2 = vld [vmem:[%s1119_s0 + $0x8] sm:$0xff]  ;;  %v571_v61 = vlaneseq }
  0x14   :  { %854 = vset.pattern.permute.xlu1 %v929_v0  ;;  %853 = vset.pattern.permute.xlu0 %v929_v0  ;;  %v994_v3 = vld [vmem:[%s1120_s1 + $0x8] sm:$0xff]  ;;  %v35_v4 = vsel %vm34_vm0, %v984_v1, -inf  ;;  %v38_v5 = vsel %vm34_vm0, %v989_v2, -inf  ;;  %v1004_v6 = vld [vmem:[%s1120_s1] sm:$0xff]  ;;  %v930_v7 = vmov 1   ;;  %v931_v8 = vmov 2  }
  0x15   :  { %568 = vperm.xlu1 %854, %v994_v3   ;;  %36 = vmax.xlane.f32.xlu0 %v35_v4  ;;  %v932_v9 = vmov 3   ;;  %v933_v10 = vmov 4   ;;  %v53_v11 = vld [vmem:[%s1121_s2] sm:$0xf]  ;;  %vm60_vm1 = vcmask 1043456   ;;  %v934_v12 = vmov 5  }
  0x16   :  { %v62_v13 = vsel %vm60_vm1, %v53_v11, 0  ;;  %v935_v14 = vmov 6   ;;  %v936_v16 = vmov 7   ;;  %v937_v20 = vmov 9   ;;  %v559_v4 = vld [vmem:[#allocation2] sm:$0xff]  ;;  %s940_s2 = smov [#allocation5]  }
  0x17   :  { %v1019_v15 = vand.u32 4294901760, %v62_v13  ;;  %v938_v22 = vmov 8   ;;  %v939_v23 = vmov 10   ;;  %v1073_v0 = vshrl.u32 %v571_v61, 7  ;;  %s768_s10 = sshll.u32 %s940_s2, 4  ;;  %s769_s10 = int_to_ptr.vmem [resolvable:$true] %s768_s10 }
  0x18   :  { %s900_s11 = scalar_lea.vmem %s769_s10, 256  ;;  %p905_p9 = scmp.lt.s32.totalorder %s769_s10, %s769_s10 }
  0x19   :  { %855 = vset.pattern.permute.xlu1 %v930_v7  ;;  %39 = vmax.xlane.f32.xlu0 %v38_v5  ;;  %v1028_v17 = vsub.f32 %v62_v13, %v1019_v15  ;;  %v591_v5 = vsub.s32 1, %v1073_v0  ;;  %v609_v7 = vsub.s32 2, %v1073_v0  ;;  %v627_v11 = vsub.s32 3, %v1073_v0  ;;  %p901_p8 = scmp.ne.s32.totalorder %s769_s10, %s900_s11  ;;  %p906_p10 = scmp.lt.s32.totalorder %s900_s11, %s900_s11 }
  0x1a   :  { %582 = vperm.xlu1 %855, %v1004_v6   ;;  %813 = vmatprep.subr.mxu0 %v1019_v15 }
  0x1b   :  { %798 = vmatprep.subr.mxu1 %v1019_v15  ;;  %814 = vmatpush3.msra.mxu0 %v1019_v15  ;;  %v153_v18 = vand.u32 4294901760, %v1028_v17  ;;  %p907_p11 = por %p906_p10, %p905_p9 }
  0x1c   :  { %799 = vmatpush3.msra.mxu1 %v1019_v15 }
  0x1d   :  { %v154_v19 = vsub.f32 %v1028_v17, %v153_v18  ;;  %818 = vmatprep.subr.mxu0 %v153_v18  ;;  %p908_p12 = pnand %p907_p11, %p901_p8 }
  0x1e   :  { %586 = vperm.xlu1 %855, %v994_v3  }
  0x1f   :  { %v155_v21 = vand.u32 4294901760, %v154_v19  ;;  %v628_v19 = vrot.slane %v559_v4, %v627_v11 }
  0x21   :  { %803 = vmatprep.subr.mxu1 %v155_v21 }
  0x22   :  { %856 = vset.pattern.permute.xlu1 %v931_v8 }
  0x23   :  { %600 = vperm.xlu1 %856, %v1004_v6  }
  0x27   :  { %604 = vperm.xlu1 %856, %v994_v3  }
  0x2b   :  { %857 = vset.pattern.permute.xlu1 %v932_v9 }
  0x2c   :  { %618 = vperm.xlu1 %857, %v1004_v6  }
  0x2f   :  { %563 = vperm.xlu0 %853, %v1004_v6  }
  0x30   :  { %622 = vperm.xlu1 %857, %v994_v3  }
  0x33   :  { %859 = vset.pattern.permute.xlu0 %v933_v10 }
  0x34   :  { %858 = vset.pattern.permute.xlu1 %v933_v10  ;;  %640 = vperm.xlu0 %859, %v994_v3   ;;  %v592_v10 = vrot.slane %v559_v4, %v591_v5 }
  0x35   :  { %636 = vperm.xlu1 %858, %v1004_v6  }
  0x38   :  { %861 = vset.pattern.permute.xlu0 %v935_v14 }
  0x39   :  { %860 = vset.pattern.permute.xlu1 %v934_v12  ;;  %672 = vperm.xlu0 %861, %v1004_v6  }
  0x3a   :  { %654 = vperm.xlu1 %860, %v1004_v6  }
  0x3d   :  { %864 = vset.pattern.permute.xlu0 %v936_v16 }
  0x3e   :  { %658 = vperm.xlu1 %860, %v994_v3   ;;  %694 = vperm.xlu0 %864, %v994_v3  }
  0x42   :  { %862 = vset.pattern.permute.xlu1 %v935_v14  ;;  %866 = vset.pattern.permute.xlu0 %v937_v20  ;;  %v610_v14 = vrot.slane %v559_v4, %v609_v7 }
  0x43   :  { %676 = vperm.xlu1 %862, %v994_v3   ;;  %726 = vperm.xlu0 %866, %v1004_v6  }
  0x47   :  { %863 = vset.pattern.permute.xlu1 %v936_v16  ;;  %869 = vset.pattern.permute.xlu0 %v939_v23 }
  0x48   :  { %690 = vperm.xlu1 %863, %v1004_v6   ;;  %748 = vperm.xlu0 %869, %v994_v3  }
  0x4c   :  { %865 = vset.pattern.permute.xlu1 %v938_v22 }
  0x4d   :  { %708 = vperm.xlu1 %865, %v1004_v6  }
  0x51   :  { %712 = vperm.xlu1 %865, %v994_v3  }
  0x55   :  { %867 = vset.pattern.permute.xlu1 %v937_v20  ;;  %v663_v20 = vsub.s32 5, %v1073_v0 }
  0x56   :  { %730 = vperm.xlu1 %867, %v994_v3   ;;  %v573_v3 = vsub.s32 0, %v1073_v0 }
  0x5a   :  { %868 = vset.pattern.permute.xlu1 %v939_v23 }
  0x94   :  { %v569_v46 = vpop.permute.xlu1 %568 }
  0x99   :  { %v583_v47 = vpop.permute.xlu1 %582 }
  0x9d   :  { %v587_v48 = vpop.permute.xlu1 %586 }
  0xa2   :  { %v37_v24 = vpop.xlane.xlu0 %36  ;;  %v1051_v49 = vpop.permute.xlu1 %600 }
  0xa3   :  { %v41_v25 = vsub.f32 %v984_v1, %v37_v24  ;;  %v593_v24 = vsub.f32 %v583_v47, %v592_v10 }
  0xa5   :  { %v43_v26 = vmul.f32 1.442695, %v41_v25 }
  0xa6   :  { %v40_v27 = vpop.xlane.xlu0 %39  ;;  %v605_v50 = vpop.permute.xlu1 %604 }
  0xa7   :  { %870 = vpow2.f32 %v43_v26  ;;  %v42_v28 = vsub.f32 %v989_v2, %v40_v27 }
  0xa9   :  { %v45_v29 = vmul.f32 1.442695, %v42_v28 }
  0xab   :  { %872 = vpow2.f32 %v45_v29  ;;  %v1053_v51 = vpop.permute.xlu1 %618  ;;  %v612_v29 = vsub.f32 %v605_v50, %v610_v14  ;;  %v560_v50 = vld [vmem:[#allocation2 + $0x8] sm:$0x7] }
  0xae   :  { %v564_v63 = vpop.permute.xlu0 %563 }
  0xaf   :  { %v1055_v52 = vpop.permute.xlu1 %622 }
  0xb1   :  { %v871_v30 = vpop.eup %870 }
  0xb2   :  { %v47_v31 = vsel %vm34_vm0, %v871_v30, 0.0  ;;  %v55_v32 = vsel %vm34_vm0, %v871_v30, 0  ;;  %v681_v30 = vsub.s32 6, %v1073_v0 }
  0xb3   :  { %48 = vadd.xlane.f32.xlu1 %v47_v31  ;;  %v130_v33 = vand.u32 4294901760, %v55_v32  ;;  %v1075_v2 = vpop.permute.xlu0 %640 }
  0xb4   :  { %v1057_v53 = vpop.permute.xlu1 %636 }
  0xb5   :  { %v873_v34 = vpop.eup %872  ;;  %v131_v35 = vsub.f32 %v55_v32, %v130_v33  ;;  %v611_v32 = vsub.f32 %v1051_v49, %v610_v14 }
  0xb6   :  { %v50_v36 = vsel %vm34_vm0, %v873_v34, 0.0  ;;  %v58_v37 = vsel %vm34_vm0, %v873_v34, 0 }
  0xb7   :  { %51 = vadd.xlane.f32.xlu1 %v50_v36  ;;  %v132_v38 = vand.u32 4294901760, %v131_v35  ;;  %v140_v39 = vand.u32 4294901760, %v58_v37 }
  0xb8   :  { %v1080_v9 = vpop.permute.xlu0 %672 }
  0xb9   :  { %815 = vmatprep.mubr.f32.mxu0 %v132_v38  ;;  %v133_v40 = vsub.f32 %v131_v35, %v132_v38  ;;  %v141_v41 = vsub.f32 %v58_v37, %v140_v39  ;;  %v1059_v54 = vpop.permute.xlu1 %654  ;;  %v630_v37 = vsub.f32 %v1055_v52, %v628_v19  ;;  %v664_v38 = vrot.slane %v559_v4, %v663_v20 }
  0xbb   :  { %v134_v42 = vand.u32 4294901760, %v133_v40  ;;  %v142_v43 = vand.u32 4294901760, %v141_v41  ;;  %v595_v40 = vand.u32 2147483647, %v593_v24  ;;  %v632_v52 = vand.u32 2147483647, %v630_v37 }
  0xbd   :  { %800 = vmatprep.mubr.f32.mxu1 %v134_v42  ;;  %816 = vmatmul.mubr.f32.vlgmr.msra.gmra.mrb[0].mxu0 %v142_v43  ;;  %v143_v44 = vsub.f32 %v141_v41, %v142_v43  ;;  %v1061_v55 = vpop.permute.xlu1 %658  ;;  %v695_v26 = vpop.permute.xlu0 %694  ;;  %v699_v42 = vsub.s32 7, %v1073_v0 }
  0xbe   :  { %820 = vmatprep.mubr.f32.mxu0 %v130_v33  ;;  %819 = vmatpush3.msra.mxu0 %v153_v18  ;;  %v594_v18 = vsub.f32 %v587_v48, %v592_v10  ;;  %v613_v48 = vand.u32 2147483647, %v611_v32 }
  0xbf   :  { %v144_v45 = vand.u32 4294901760, %v143_v44  ;;  %823 = vmatprep.subr.mxu0 %v1019_v15  ;;  %v614_v44 = vand.u32 2147483647, %v612_v29 }
  0xc0   :  { %v596_v36 = vand.u32 2147483647, %v594_v18 }
  0xc1   :  { %801 = vmatmul.mubr.f32.vlgmr.msra.gmra.mrb[0].mxu1 %v144_v45  ;;  %v682_v45 = vrot.slane %v559_v4, %v681_v30 }
  0xc2   :  { %804 = vmatpush3.msra.mxu1 %v155_v21  ;;  %805 = vmatprep.mubr.f32.mxu1 %v130_v33  ;;  %v1063_v56 = vpop.permute.xlu1 %676 }
  0xc3   :  { %808 = vmatprep.subr.mxu1 %v1028_v17  ;;  %v684_v11 = vsub.f32 %v1063_v56, %v682_v45 }
  0xc5   :  { %821 = vmatmul.mubr.f32.vlgmr.msra.gmra.mrb[0].mxu0 %v140_v39  ;;  %v686_v56 = vand.u32 2147483647, %v684_v11 }
  0xc6   :  { %825 = vmatprep.mubr.f32.mxu0 %v130_v33  ;;  %824 = vmatpush3.msra.mxu0 %v1019_v15  ;;  %v645_v15 = vsub.s32 4, %v1073_v0 }
  0xc7   :  { %v1065_v57 = vpop.permute.xlu1 %690 }
  0xc8   :  { %744 = vperm.xlu1 %868, %v1004_v6   ;;  %v574_v6 = vrot.slane %v559_v4, %v573_v3  ;;  %v646_v33 = vrot.slane %v559_v4, %v645_v15  ;;  %v736_v15 = vrot.slane %v560_v50, %v591_v5 }
  0xc9   :  { %806 = vmatmul.mubr.f32.vlgmr.msra.gmra.mrb[0].mxu1 %v140_v39 }
  0xca   :  { %809 = vmatpush3.msra.mxu1 %v1028_v17  ;;  %810 = vmatprep.mubr.f32.mxu1 %v131_v35  ;;  %v576_v13 = vsub.f32 %v569_v46, %v574_v6  ;;  %v575_v16 = vsub.f32 %v564_v63, %v574_v6  ;;  %v648_v47 = vsub.f32 %v1075_v2, %v646_v33 }
  0xcb   :  { %v647_v49 = vsub.f32 %v1057_v53, %v646_v33  ;;  %v666_v63 = vsub.f32 %v1061_v55, %v664_v38  ;;  %v754_v55 = vrot.slane %v560_v50, %v609_v7 }
  0xcc   :  { %v1067_v58 = vpop.permute.xlu1 %708  ;;  %v578_v28 = vand.u32 2147483647, %v576_v13  ;;  %v577_v34 = vand.u32 2147483647, %v575_v16  ;;  %v650_v2 = vand.u32 2147483647, %v648_v47  ;;  %v683_v16 = vsub.f32 %v1080_v9, %v682_v45 }
  0xcd   :  { %826 = vmatmul.mubr.f32.vlgmr.msra.gmra.mrb[0].mxu0 %v140_v39  ;;  %v649_v14 = vand.u32 2147483647, %v647_v49 }
  0xce   :  { %v685_v9 = vand.u32 2147483647, %v683_v16 }
  0xd0   :  { %v1069_v59 = vpop.permute.xlu1 %712 }
  0xd1   :  { %811 = vmatmul.mubr.f32.vlgmr.msra.gmra.mrb[0].mxu1 %v141_v41  ;;  %v629_v41 = vsub.f32 %v1053_v51, %v628_v19  ;;  %v665_v51 = vsub.f32 %v1059_v54, %v664_v38 }
  0xd3   :  { %v631_v6 = vand.u32 2147483647, %v629_v41  ;;  %v667_v20 = vand.u32 2147483647, %v665_v51 }
  0xd5   :  { %v1071_v60 = vpop.permute.xlu1 %730 }
 0x140   :  { %v49_v62 = vpop.xlane.xlu1 %48 }
 0x144   :  { %v52_v1 = vpop.xlane.xlu1 %51 }
 0x145   :  { %874 = vrcp.f32 %v52_v1 }
 0x146   :  { %876 = vrcp.f32 %v49_v62  ;;  %v727_v62 = vpop.permute.xlu0 %726 }
 0x147   :  { %v737_v29 = vsub.f32 %v727_v62, %v736_v15 }
 0x14f   :  { %v875_v23 = vpop.eup %874 }
 0x150   :  { %v877_v27 = vpop.eup %876 }
 0x1a0   :  { %v827_v8 = vpop.f32.mrb[0].mxu0 }
 0x1a1   :  { %v543_v12 = vpop.f32.mrb[1].mxu0 }
 0x1a4   :  { %v812_v17 = vpop.f32.mrb[0].mxu1 }
 0x1a5   :  { %v828_v21 = vadd.f32 %v827_v8, %v812_v17  ;;  %v302_v22 = vpop.f32.mrb[1].mxu1  ;;  %v700_v8 = vrot.slane %v559_v4, %v699_v42  ;;  %v668_v17 = vand.u32 2147483647, %v666_v63 }
 0x1a6   :  { %v829_v25 = vadd.f32 %v543_v12, %v302_v22  ;;  %v718_v12 = vrot.slane %v560_v50, %v573_v3 }
 0x1a7   :  { %v556_v31 = vmul.f32 %v875_v23, %v828_v21  ;;  %v702_v19 = vsub.f32 %v695_v26, %v700_v8  ;;  %v701_v54 = vsub.f32 %v1065_v57, %v700_v8  ;;  %v749_v21 = vpop.permute.xlu0 %748  ;;  %v745_v23 = vpop.permute.xlu1 %744 }
 0x1a8   :  { %v555_v35 = vmul.f32 %v877_v27, %v829_v25  ;;  %v720_v3 = vsub.f32 %v1069_v59, %v718_v12  ;;  %v719_v5 = vsub.f32 %v1067_v58, %v718_v12  ;;  %v738_v25 = vsub.f32 %v1071_v60, %v736_v15 }
 0x1a9   :  { %v580_v39 = vadd.f32 %v578_v28, %v556_v31  ;;  %v704_v27 = vand.u32 2147483647, %v702_v19  ;;  %v756_v0 = vsub.f32 %v749_v21, %v754_v55  ;;  %v703_v7 = vand.u32 2147483647, %v701_v54 }
 0x1aa   :  { %v579_v43 = vadd.f32 %v577_v34, %v555_v35  ;;  %v755_v57 = vsub.f32 %v745_v23, %v754_v55  ;;  %v722_v30 = vand.u32 2147483647, %v720_v3  ;;  %v721_v32 = vand.u32 2147483647, %v719_v5 }
 0x1ab   :  { %v598_v46 = vadd.f32 %v596_v36, %v580_v39  ;;  %v740_v59 = vand.u32 2147483647, %v738_v25  ;;  %v758_v35 = vand.u32 2147483647, %v756_v0  ;;  %v739_v58 = vand.u32 2147483647, %v737_v29 }
 0x1ac   :  { %v597_v61 = vadd.f32 %v595_v40, %v579_v43  ;;  %v757_v37 = vand.u32 2147483647, %v755_v57 }
 0x1ad   :  { %v616_v1 = vadd.f32 %v614_v44, %v598_v46 }
 0x1ae   :  { %v615_v10 = vadd.f32 %v613_v48, %v597_v61 }
 0x1af   :  { %v634_v13 = vadd.f32 %v632_v52, %v616_v1 }
 0x1b0   :  { %v633_v53 = vadd.f32 %v631_v6, %v615_v10 }
 0x1b1   :  { %v652_v18 = vadd.f32 %v650_v2, %v634_v13 }
 0x1b2   :  { %v651_v4 = vadd.f32 %v649_v14, %v633_v53 }
 0x1b3   :  { %v670_v22 = vadd.f32 %v668_v17, %v652_v18 }
 0x1b4   :  { %v669_v24 = vadd.f32 %v667_v20, %v651_v4 }
 0x1b5   :  { %v688_v26 = vadd.f32 %v686_v56, %v670_v22 }
 0x1b6   :  { %v687_v28 = vadd.f32 %v685_v9, %v669_v24 }
 0x1b7   :  { %v706_v31 = vadd.f32 %v704_v27, %v688_v26 }
 0x1b8   :  { %v705_v33 = vadd.f32 %v703_v7, %v687_v28 }
 0x1b9   :  { %v724_v34 = vadd.f32 %v722_v30, %v706_v31 }
 0x1ba   :  { %v723_v36 = vadd.f32 %v721_v32, %v705_v33 }
 0x1bb   :  { %v742_v38 = vadd.f32 %v740_v59, %v724_v34 }
 0x1bc   :  { %v741_v60 = vadd.f32 %v739_v58, %v723_v36 }
 0x1bd   :  { %v760_v39 = vadd.f32 %v758_v35, %v742_v38 }
 0x1be   :  { %v759_v40 = vadd.f32 %v757_v37, %v741_v60 }
 0x1bf   :  { %762 = vst [vmem:[#allocation5 + $0x8] sm:$0xff] %v760_v39 }
 0x1c0   :  { %761 = vst [vmem:[#allocation5] sm:$0xff] %v759_v40 }
 0x1c1   :  { %911 = shalt.err (!%p908_p12)
}
 0x1c2   :  { %s912_s14 = scalar_lea.hbm %s1123_s4, 256 }
 0x1c3   :  { %p913_p13 = scmp.ne.s32.totalorder %s1123_s4, %s912_s14  ;;  %p916_p0 = scmp.lt.u32.totalorder %s912_s14, %s1123_s4 }
 0x1c5   :  { %p918_p1 = pnand %p916_p0, %p913_p13 }
 0x1c7   :  { %921 = shalt.err (!%p918_p1)
}
 0x1c8   :  { %774 = dma.vmem_to_hbm [thread:$0]  %s769_s10, 256, %s1123_s4, [#allocation4], %s927_s25, %s927_s25, %s928_s26  }
 0x1c9   :  { %924 = dma.done.wait [#allocation4], 256  }
 0x1ca   :  { %925 = vsyncadd [#allocation4], 4294967040 }
 0x1cb   :  { %778 = vsyncpa [#allocation3], 1 }
 0x1cc   :  { %779 = vsyncpa [#allocation4], 1 }

</bundles_post_ra>
